<compile_context>
chip_gen: v7x
topology: tpu7x:2x2x1
jax: 0.10.0
libtpu: 0.0.40
codegen_flags: <defaults>
</compile_context>

<pallas_src>
import jax
import jax.numpy as jnp
from jax.experimental import pallas as pl
from jax.experimental.pallas import tpu as pltpu

_LANE = 128
# Widest lane-dense widths tried for the no-copy fast path (multiples of 128).
_L_CANDIDATES = (8192, 4096, 2048, 1024, 512, 256, 128)


def _swish_kernel(x_ref, o_ref):
    x = x_ref[...]
    # Compute in f32 (safe on every TPU generation; compute is free here —
    # the kernel is HBM-bandwidth bound).  sigmoid(x) = 1 / (1 + exp(-x));
    # exp(-x) may overflow to +inf for very negative x, but 1/(1+inf) = 0,
    # which is the correct limit, so the result stays finite and correct.
    xf = x.astype(jnp.float32)
    y = xf * (1.0 / (1.0 + jnp.exp(-xf)))
    o_ref[...] = y.astype(o_ref.dtype)


def _run_2d(x2d, block_bytes):
    """Run the elementwise kernel over a lane-dense (rows, L) array."""
    rows, L = x2d.shape
    itemsize = jnp.dtype(x2d.dtype).itemsize

    # Rows per block: fill ~block_bytes per block; multiple of 8 (sublane)
    # unless a single block covers the whole array.
    block_rows = max(8, block_bytes // (L * itemsize))
    block_rows = min(block_rows, rows)
    if block_rows < rows:
        block_rows = max(8, (block_rows // 8) * 8)

    grid = (pl.cdiv(rows, block_rows),)

    return pl.pallas_call(
        _swish_kernel,
        out_shape=jax.ShapeDtypeStruct((rows, L), x2d.dtype),
        grid_spec=pltpu.PrefetchScalarGridSpec(
            num_scalar_prefetch=0,
            grid=grid,
            in_specs=[pl.BlockSpec((block_rows, L), lambda i: (i, 0))],
            out_specs=pl.BlockSpec((block_rows, L), lambda i: (i, 0)),
        ),
        compiler_params=pltpu.CompilerParams(
            dimension_semantics=("parallel",),      # lets v7x shard across 2 TCs
            vmem_limit_bytes=32 * 1024 * 1024,      # 2x(in+out) 4 MiB buffers fit
        ),
    )(x2d)


def swish(x, *, block_bytes=4 * 1024 * 1024):
    """Elementwise Swish / SiLU on an array of any shape and float dtype."""
    orig_shape = x.shape
    n = x.size
    if n == 0:
        return x

    if n % _LANE == 0:
        # Fast path: a free reshape of the contiguous buffer into a lane-dense
        # 2D view — no padding, no extra HBM round-trips.
        L = next(l for l in _L_CANDIDATES if n % l == 0)
        out = _run_2d(x.reshape(n // L, L), block_bytes)
        return out.reshape(orig_shape)

    # Ragged fallback (rare): pad the flat length to a multiple of (8 * 128).
    # Padded tail computes swish(0) = 0 and is sliced off afterwards.
    tile = 8 * _LANE
    n_pad = pl.cdiv(n, tile) * tile
    x2d = jnp.pad(x.reshape(-1), (0, n_pad - n)).reshape(n_pad // _LANE, _LANE)
    out = _run_2d(x2d, block_bytes)
    return out.reshape(-1)[:n].reshape(orig_shape)


if __name__ == "__main__":
    key = jax.random.PRNGKey(0)
    k1, k2 = jax.random.split(key)

    # Primary small shape consistent with Conformer usage: (batch, seq, hidden).
    x = jax.random.normal(key, (2, 8, 32), dtype=jnp.float32)
    y = swish(x)
    jax.block_until_ready(y)
    y_ref = x * jax.nn.sigmoid(x)
    assert y.shape == x.shape and y.dtype == x.dtype
    assert jnp.allclose(y, y_ref, atol=1e-6, rtol=1e-6)

    # Lane-dense fast path with several grid steps (small block to exercise it).
    x2 = jax.random.normal(k1, (8, 128, 512), dtype=jnp.float32)
    y2 = swish(x2, block_bytes=128 * 1024)
    jax.block_until_ready(y2)
    assert jnp.allclose(y2, x2 * jax.nn.sigmoid(x2), atol=1e-6, rtol=1e-6)

    # bf16 input (common Conformer training dtype) still uses the fast path.
    xb = jax.random.normal(k1, (4, 64, 256), dtype=jnp.bfloat16)
    yb = swish(xb)
    jax.block_until_ready(yb)
    assert yb.dtype == jnp.bfloat16
    assert jnp.allclose(
        yb.astype(jnp.float32),
        (xb.astype(jnp.float32) * jax.nn.sigmoid(xb.astype(jnp.float32))),
        atol=2e-2, rtol=2e-2)

    # Ragged fallback path (size not a multiple of 128).
    x3 = jax.random.normal(k2, (3, 7, 5), dtype=jnp.float32)
    y3 = swish(x3)
    jax.block_until_ready(y3)
    assert y3.shape == x3.shape and y3.dtype == x3.dtype
    assert jnp.allclose(y3, x3 * jax.nn.sigmoid(x3), atol=1e-6, rtol=1e-6)

    print("KERNEL_OK")
</pallas_src>

<mosaic_0001>
module attributes {stable_mosaic.version = 11 : i64} {
  func.func @_swish_kernel(%arg0: i32, %arg1: memref<1x512xf32, #tpu.memory_space<vmem>>, %arg2: memref<1x512xf32, #tpu.memory_space<vmem>>) attributes {dimension_semantics = [#tpu.dimension_semantics<parallel>], iteration_bounds = array<i64: 1>, scalar_prefetch = 0 : i64, scratch_operands = 0 : i64, tpu.core_type = #tpu.core_type<tc>, window_params = [{transform_indices = @transform_0, window_bounds = array<i64: 1, 512>}, {transform_indices = @transform_1, window_bounds = array<i64: 1, 512>}]} {
    %c0 = arith.constant 0 : index
    %c0_0 = arith.constant 0 : index
    %0 = vector.load %arg1[%c0, %c0_0] : memref<1x512xf32, #tpu.memory_space<vmem>>, vector<1x512xf32>
    %cst = arith.constant 0.000000e+00 : f32
    %1 = vector.broadcast %cst : f32 to vector<1x512xf32>
    %2 = arith.subf %1, %0 : vector<1x512xf32>
    %3 = math.exp %2 : vector<1x512xf32>
    %cst_1 = arith.constant 1.000000e+00 : f32
    %4 = vector.broadcast %cst_1 : f32 to vector<1x512xf32>
    %5 = arith.addf %4, %3 : vector<1x512xf32>
    %cst_2 = arith.constant 1.000000e+00 : f32
    %6 = vector.broadcast %cst_2 : f32 to vector<1x512xf32>
    %7 = arith.divf %6, %5 : vector<1x512xf32>
    %8 = arith.mulf %0, %7 : vector<1x512xf32>
    %c0_3 = arith.constant 0 : index
    %c0_4 = arith.constant 0 : index
    %9 = vector.load %arg2[%c0_3, %c0_4] : memref<1x512xf32, #tpu.memory_space<vmem>>, vector<1x512xf32>
    tpu.vector_store %arg2[%c0_3, %c0_4], %8 {strides = array<i32>} : memref<1x512xf32, #tpu.memory_space<vmem>>, vector<1x512xf32>,
    return
  }
  func.func @transform_0(%arg0: i32) -> (i32, i32) {
    %c0_i32 = arith.constant 0 : i32
    %c0_i32_0 = arith.constant 0 : i32
    return %arg0, %c0_i32 : i32, i32
  }
  func.func @transform_1(%arg0: i32) -> (i32, i32) {
    %c0_i32 = arith.constant 0 : i32
    %c0_i32_0 = arith.constant 0 : i32
    return %arg0, %c0_i32 : i32, i32
  }
}

</mosaic_0001>

<bundles_post_ra>
// kernel: tpu_custom_call.1
= control target key start
LH: loop header
LB: loop body
LE: loop exit
PB: predicated region body
PF: predicated region fallthrough
CT: control target
= control target key end

     0   :  { %6 = vsyncpa [#allocation3], 0  ;;  %s139_s0 = inlined_call_operand.hbm [shape: f32[1,512], index: 0, kind: input, shape index: {}]   ;;  %s140_s1 = inlined_call_operand.hbm [shape: f32[1,512], index: 1, kind: output, shape index: {}]  }
   0x1   :  { %7 = vsyncpa [#allocation4], 0  ;;  %s103_s6 = smov [#allocation2]   ;;  %s55_s10 = scalar_lea.hbm %s139_s0, 64 }
   0x2   :  { %s14_s7 = sshll.u32 %s103_s6, 4  ;;  %p56_p0 = scmp.ne.s32.totalorder %s139_s0, %s55_s10  ;;  %s15_s7 = int_to_ptr.vmem [resolvable:$true] %s14_s7 }
   0x3   :  { %p59_p1 = scmp.lt.u32.totalorder %s55_s10, %s139_s0 }
   0x5   :  { %p61_p2 = pnand %p59_p1, %p56_p0 }
   0x7   :  { %64 = shalt.err (!%p61_p2)
}
   0x8   :  { %s65_s15 = scalar_lea.vmem %s15_s7, 64  ;;  %p70_p4 = scmp.lt.s32.totalorder %s15_s7, %s15_s7 }
   0x9   :  { %p66_p3 = scmp.ne.s32.totalorder %s15_s7, %s65_s15  ;;  %p71_p5 = scmp.lt.s32.totalorder %s65_s15, %s65_s15 }
   0xb   :  { %p72_p6 = por %p71_p5, %p70_p4 }
   0xd   :  { %p73_p7 = pnand %p72_p6, %p66_p3 }
   0xf   :  { %76 = shalt.err (!%p73_p7)
}
  0x10   :  { %17 = dma.hbm_to_vmem [thread:$0]  %s139_s0, 64, %s15_s7, [#allocation3]  }
  0x11   :  { %99 = dma.done.wait [#allocation3], 64  }
  0x12   :  { %100 = vsyncadd [#allocation3], 4294967232  ;;  %v21_v0 = vld [vmem:[#allocation2] sm:$0xf]  ;;  %v29_v5 = vlaneseq  ;;  %s104_s18 = smov [#allocation5]  }
  0x13   :  { %v22_v1 = vsub.f32 0.0, %v21_v0  ;;  %s40_s19 = sshll.u32 %s104_s18, 4  ;;  %s41_s19 = int_to_ptr.vmem [resolvable:$true] %s40_s19 }
  0x14   :  { %vm31_vm0 = vcmp.lt.s32.totalorder %v29_v5, 512  ;;  %s77_s20 = scalar_lea.vmem %s41_s19, 64  ;;  %p82_p9 = scmp.lt.s32.totalorder %s41_s19, %s41_s19 }
  0x15   :  { %v23_v2 = vmul.f32 1.442695, %v22_v1  ;;  %p78_p8 = scmp.ne.s32.totalorder %s41_s19, %s77_s20  ;;  %p83_p10 = scmp.lt.s32.totalorder %s77_s20, %s77_s20 }
  0x17   :  { %51 = vpow2.f32 %v23_v2  ;;  %p84_p11 = por %p83_p10, %p82_p9 }
  0x19   :  { %p85_p12 = pnand %p84_p11, %p78_p8 }
  0x21   :  { %v52_v3 = vpop.eup %51 }
  0x22   :  { %v25_v4 = vadd.f32 1.0, %v52_v3 }
  0x24   :  { %53 = vrcp.f32 %v25_v4 }
  0x2e   :  { %v54_v6 = vpop.eup %53 }
  0x2f   :  { %v28_v7 = vmul.f32 %v54_v6, %v21_v0 }
  0x31   :  { %33 = vst.msk [vmem:[#allocation5] sm:$0xf] %vm31_vm0, %v28_v7 }
  0x32   :  { %88 = shalt.err (!%p85_p12)
}
  0x33   :  { %s89_s22 = scalar_lea.hbm %s140_s1, 64 }
  0x34   :  { %p90_p13 = scmp.ne.s32.totalorder %s140_s1, %s89_s22  ;;  %p93_p0 = scmp.lt.u32.totalorder %s89_s22, %s140_s1 }
  0x36   :  { %p95_p1 = pnand %p93_p0, %p90_p13 }
  0x38   :  { %98 = shalt.err (!%p95_p1)
}
  0x39   :  { %43 = dma.vmem_to_hbm [thread:$0]  %s41_s19, 64, %s140_s1, [#allocation4]  }
  0x3a   :  { %101 = dma.done.wait [#allocation4], 64  }
  0x3b   :  { %102 = vsyncadd [#allocation4], 4294967232 }
  0x3c   :  { %47 = vsyncpa [#allocation3], 1 }
  0x3d   :  { %48 = vsyncpa [#allocation4], 1 }

</bundles_post_ra>
